<compile_context>
chip_gen: v6e
topology: v6e:2x2x1
jax: 0.10.0
libtpu: 0.0.40
codegen_flags: <defaults>
</compile_context>

<pallas_src>
import functools

import jax
import jax.numpy as jnp
from jax.experimental import pallas as pl
from jax.experimental.pallas import tpu as pltpu

LANE = 128
SUBLANE = 8


def _round_up(x, m):
    return ((x + m - 1) // m) * m


def actor_kernel(x_ref, w1_ref, b1_ref, w2_ref, b2_ref, w3_ref, b3_ref, o_ref):
    # Matmul operands take the weights' dtype (bf16 or f32); accumulation and
    # all element-wise work (bias add, relu, tanh) stay in f32.
    mm_dtype = w1_ref.dtype

    # fc1 + relu  (MXU matmul, f32 accumulation)
    h1 = jnp.dot(x_ref[...].astype(mm_dtype), w1_ref[...],
                 preferred_element_type=jnp.float32)
    h1 = jnp.maximum(h1 + b1_ref[...], 0.0)

    # fc2 + relu
    h2 = jnp.dot(h1.astype(mm_dtype), w2_ref[...],
                 preferred_element_type=jnp.float32)
    h2 = jnp.maximum(h2 + b2_ref[...], 0.0)

    # fc_mean + tanh (tanh lowers to the EUP); output block is lane-padded.
    m = jnp.dot(h2.astype(mm_dtype), w3_ref[...],
                preferred_element_type=jnp.float32)
    o_ref[...] = jnp.tanh(m + b3_ref[...]).astype(o_ref.dtype)


def _choose_batch_tiling(B, tm_max):
    """Adaptive batch tiling.

    * As few grid steps as possible (amortize per-step overhead).
    * Minimal row padding: tm = round_up(ceil(B / n_steps), 8).
    * Even number of steps when multi-step, so the "parallel" batch axis
      shards evenly across v7x's two TensorCores (one extra ~0.35 us step on
      1-TC v5e/v6e — negligible).
    """
    n_steps = -(-B // tm_max)
    if n_steps > 1 and n_steps % 2 != 0:
        n_steps += 1
    tm = _round_up(-(-B // n_steps), SUBLANE)
    b_pad = n_steps * tm
    return tm, b_pad, n_steps


@functools.partial(jax.jit,
                   static_argnames=("matmul_dtype", "out_dtype", "tm_max"))
def actor_forward(x, params, *, matmul_dtype=jnp.bfloat16, out_dtype=None,
                  tm_max=2048):
    w1, b1, w2, b2, w3, b3 = params
    B, in_dim = x.shape
    hidden1 = w1.shape[1]
    hidden2 = w2.shape[1]
    out_dim = w3.shape[1]

    # Output dtype: bf16 by default on the fast path (halves padded-slab
    # writeback; tanh output is in [-1, 1]); f32 on the f32-matmul path.
    if out_dtype is None:
        out_dtype = jnp.float32 if jnp.dtype(matmul_dtype) == jnp.float32 \
            else jnp.bfloat16

    # --- lane-pad the output head to a multiple of 128 (zero-filled cols) ---
    out_pad = _round_up(max(out_dim, LANE), LANE)
    if out_pad != out_dim:
        w3 = jnp.zeros((w3.shape[0], out_pad), w3.dtype).at[:, :out_dim].set(w3)
        b3 = jnp.zeros((1, out_pad), b3.dtype).at[:, :out_dim].set(b3)

    # --- adaptive batch tiling (minimal padding, v7x-balanced grid) ---
    tm, b_pad, n_steps = _choose_batch_tiling(B, tm_max)
    if b_pad != B:
        x = jnp.pad(x, ((0, b_pad - B), (0, 0)))

    # --- matmul operands in bf16 (or f32); biases stay f32 ---
    # (the x -> bf16 cast happens inside the kernel, fused with the load)
    w1c = w1.astype(matmul_dtype)
    w2c = w2.astype(matmul_dtype)
    w3c = w3.astype(matmul_dtype)

    batch_spec = lambda shape: pl.BlockSpec(shape, lambda i: (i, 0))   # streamed
    resident = lambda shape: pl.BlockSpec(shape, lambda i: (0, 0))     # weights stay put

    # Advisory cost hint for XLA's scheduler (no effect standalone).
    flops = 2 * b_pad * (in_dim * hidden1 + hidden1 * hidden2
                         + hidden2 * out_pad)
    bytes_accessed = (
        b_pad * in_dim * x.dtype.itemsize
        + (in_dim * hidden1 + hidden1 * hidden2 + hidden2 * out_pad)
        * jnp.dtype(matmul_dtype).itemsize
        + (hidden1 + hidden2 + out_pad) * 4
        + b_pad * out_pad * jnp.dtype(out_dtype).itemsize)
    cost = pl.CostEstimate(flops=int(flops),
                           transcendentals=int(b_pad * out_pad),
                           bytes_accessed=int(bytes_accessed))

    out = pl.pallas_call(
        actor_kernel,
        out_shape=jax.ShapeDtypeStruct((b_pad, out_pad), out_dtype),
        grid=(n_steps,),
        in_specs=[
            batch_spec((tm, in_dim)),
            resident((in_dim, hidden1)), resident((1, hidden1)),
            resident((hidden1, hidden2)), resident((1, hidden2)),
            resident((hidden2, out_pad)), resident((1, out_pad)),
        ],
        out_specs=batch_spec((tm, out_pad)),
        compiler_params=pltpu.CompilerParams(
            dimension_semantics=("parallel",),
        ),
        cost_estimate=cost,
    )(x, w1c, b1, w2c, b2, w3c, b3)

    # Slice away batch padding and the lane-padded output columns.
    # (Callers that can consume the padded slab directly avoid this re-read.)
    return out[:B, :out_dim]


def init_actor_params(key, in_dim, out_dim):
    """Deterministic init mimicking PyTorch nn.Linear default:
    U(-1/sqrt(fan_in), 1/sqrt(fan_in)) for both weights and biases."""
    ks = jax.random.split(key, 6)

    def linear(kw, kb, fan_in, fan_out):
        bound = 1.0 / jnp.sqrt(jnp.float32(fan_in))
        w = jax.random.uniform(kw, (fan_in, fan_out), jnp.float32, -bound, bound)
        b = jax.random.uniform(kb, (1, fan_out), jnp.float32, -bound, bound)
        return w, b

    w1, b1 = linear(ks[0], ks[1], in_dim, 256)
    w2, b2 = linear(ks[2], ks[3], 256, 128)
    w3, b3 = linear(ks[4], ks[5], 128, out_dim)
    return (w1, b1, w2, b2, w3, b3)


def actor_forward_ref(x, params):
    """Pure-JAX f32 reference for correctness checking."""
    w1, b1, w2, b2, w3, b3 = params
    h1 = jnp.maximum(x @ w1 + b1, 0.0)
    h2 = jnp.maximum(h1 @ w2 + b2, 0.0)
    return jnp.tanh(h2 @ w3 + b3)


# TODO(synk): the PyTorch module also owns an Adam optimizer; only the forward
# pass is implemented here (training state has no Pallas equivalent).

if __name__ == "__main__":
    key = jax.random.PRNGKey(0)
    k_x, k_p, k_x2 = jax.random.split(key, 3)

    # small shapes consistent with the module: observation dim 16, action dim 4
    batch, in_dim, out_dim = 8, 16, 4
    x = jax.random.normal(k_x, (batch, in_dim), jnp.float32)
    params = init_actor_params(k_p, in_dim, out_dim)
    ref = actor_forward_ref(x, params)

    # f32 matmul path (f32 output): tight tolerance
    out_f32 = jax.block_until_ready(
        actor_forward(x, params, matmul_dtype=jnp.float32))
    assert out_f32.shape == (batch, out_dim)
    assert out_f32.dtype == jnp.float32
    assert jnp.allclose(out_f32, ref, atol=1e-5, rtol=1e-5), "f32 mismatch"

    # bf16 matmul + bf16 output path (default, fast): loose tolerance
    out_bf16 = jax.block_until_ready(actor_forward(x, params))
    assert out_bf16.shape == (batch, out_dim)
    assert jnp.allclose(out_bf16.astype(jnp.float32), ref,
                        atol=3e-2, rtol=3e-2), "bf16 mismatch"

    # larger ragged batch: with the adaptive tiling this runs as a single
    # 1056-row tile (minimal padding) instead of 3x512 padded to 1536.
    big_batch = 1050
    x_big = jax.random.normal(k_x2, (big_batch, in_dim), jnp.float32)
    ref_big = actor_forward_ref(x_big, params)
    out_big = jax.block_until_ready(
        actor_forward(x_big, params, matmul_dtype=jnp.float32))
    assert out_big.shape == (big_batch, out_dim)
    assert jnp.allclose(out_big, ref_big, atol=1e-5, rtol=1e-5), "big mismatch"

    # force a multi-step grid (tm_max=512 -> 4 even steps of 264 rows) to
    # exercise streaming tiles, resident weights, and the v7x-balanced grid.
    out_tiled = jax.block_until_ready(
        actor_forward(x_big, params, matmul_dtype=jnp.float32, tm_max=512))
    assert out_tiled.shape == (big_batch, out_dim)
    assert jnp.allclose(out_tiled, ref_big, atol=1e-5, rtol=1e-5), \
        "tiled mismatch"

    print("KERNEL_OK")
</pallas_src>

<mosaic_0001>
module attributes {stable_mosaic.version = 11 : i64} {
  func.func @actor_kernel(%arg0: i32, %arg1: memref<8x16xf32, #tpu.memory_space<vmem>>, %arg2: memref<16x256xf32, #tpu.memory_space<vmem>>, %arg3: memref<1x256xf32, #tpu.memory_space<vmem>>, %arg4: memref<256x128xf32, #tpu.memory_space<vmem>>, %arg5: memref<1x128xf32, #tpu.memory_space<vmem>>, %arg6: memref<128x128xf32, #tpu.memory_space<vmem>>, %arg7: memref<1x128xf32, #tpu.memory_space<vmem>>, %arg8: memref<8x128xf32, #tpu.memory_space<vmem>>) attributes {dimension_semantics = [#tpu.dimension_semantics<parallel>], iteration_bounds = array<i64: 1>, scalar_prefetch = 0 : i64, scratch_operands = 0 : i64, tpu.core_type = #tpu.core_type<tc>, window_params = [{transform_indices = @transform_0, window_bounds = array<i64: 8, 16>}, {pipeline_mode = #tpu.pipeline_mode<synchronous>, transform_indices = @transform_1, window_bounds = array<i64: 16, 256>}, {pipeline_mode = #tpu.pipeline_mode<synchronous>, transform_indices = @transform_2, window_bounds = array<i64: 1, 256>}, {pipeline_mode = #tpu.pipeline_mode<synchronous>, transform_indices = @transform_3, window_bounds = array<i64: 256, 128>}, {pipeline_mode = #tpu.pipeline_mode<synchronous>, transform_indices = @transform_4, window_bounds = array<i64: 1, 128>}, {pipeline_mode = #tpu.pipeline_mode<synchronous>, transform_indices = @transform_5, window_bounds = array<i64: 128, 128>}, {pipeline_mode = #tpu.pipeline_mode<synchronous>, transform_indices = @transform_6, window_bounds = array<i64: 1, 128>}, {transform_indices = @transform_7, window_bounds = array<i64: 8, 128>}]} {
    %c0 = arith.constant 0 : index
    %c0_0 = arith.constant 0 : index
    %0 = vector.load %arg1[%c0, %c0_0] : memref<8x16xf32, #tpu.memory_space<vmem>>, vector<8x16xf32>
    %c0_1 = arith.constant 0 : index
    %c0_2 = arith.constant 0 : index
    %1 = vector.load %arg2[%c0_1, %c0_2] : memref<16x256xf32, #tpu.memory_space<vmem>>, vector<16x256xf32>
    %cst = arith.constant dense<0.000000e+00> : vector<8x256xf32>
    %2 = tpu.matmul %0, %1, %cst {dimension_numbers = #tpu.dot_dimension_numbers<[1], [0], [0], [1], [0, 0, 1, 1], [], []>} : vector<8x16xf32>, vector<16x256xf32>, vector<8x256xf32> -> vector<8x256xf32>
    %c0_3 = arith.constant 0 : index
    %c0_4 = arith.constant 0 : index
    %3 = vector.load %arg3[%c0_3, %c0_4] : memref<1x256xf32, #tpu.memory_space<vmem>>, vector<1x256xf32>
    %4 = vector.broadcast %3 : vector<1x256xf32> to vector<8x256xf32>
    %5 = arith.addf %2, %4 : vector<8x256xf32>
    %cst_5 = arith.constant 0.000000e+00 : f32
    %6 = vector.broadcast %cst_5 : f32 to vector<8x256xf32>
    %7 = arith.maximumf %5, %6 : vector<8x256xf32>
    %c0_6 = arith.constant 0 : index
    %c0_7 = arith.constant 0 : index
    %8 = vector.load %arg4[%c0_6, %c0_7] : memref<256x128xf32, #tpu.memory_space<vmem>>, vector<256x128xf32>
    %cst_8 = arith.constant dense<0.000000e+00> : vector<8x128xf32>
    %9 = tpu.matmul %7, %8, %cst_8 {dimension_numbers = #tpu.dot_dimension_numbers<[1], [0], [0], [1], [0, 0, 1, 1], [], []>} : vector<8x256xf32>, vector<256x128xf32>, vector<8x128xf32> -> vector<8x128xf32>
    %c0_9 = arith.constant 0 : index
    %c0_10 = arith.constant 0 : index
    %10 = vector.load %arg5[%c0_9, %c0_10] : memref<1x128xf32, #tpu.memory_space<vmem>>, vector<1x128xf32>
    %11 = vector.broadcast %10 : vector<1x128xf32> to vector<8x128xf32>
    %12 = arith.addf %9, %11 : vector<8x128xf32>
    %cst_11 = arith.constant 0.000000e+00 : f32
    %13 = vector.broadcast %cst_11 : f32 to vector<8x128xf32>
    %14 = arith.maximumf %12, %13 : vector<8x128xf32>
    %c0_12 = arith.constant 0 : index
    %c0_13 = arith.constant 0 : index
    %15 = vector.load %arg6[%c0_12, %c0_13] : memref<128x128xf32, #tpu.memory_space<vmem>>, vector<128x128xf32>
    %cst_14 = arith.constant dense<0.000000e+00> : vector<8x128xf32>
    %16 = tpu.matmul %14, %15, %cst_14 {dimension_numbers = #tpu.dot_dimension_numbers<[1], [0], [0], [1], [0, 0, 1, 1], [], []>} : vector<8x128xf32>, vector<128x128xf32>, vector<8x128xf32> -> vector<8x128xf32>
    %c0_15 = arith.constant 0 : index
    %c0_16 = arith.constant 0 : index
    %17 = vector.load %arg7[%c0_15, %c0_16] : memref<1x128xf32, #tpu.memory_space<vmem>>, vector<1x128xf32>
    %18 = vector.broadcast %17 : vector<1x128xf32> to vector<8x128xf32>
    %19 = arith.addf %16, %18 : vector<8x128xf32>
    %20 = math.tanh %19 : vector<8x128xf32>
    %c0_17 = arith.constant 0 : index
    %c0_18 = arith.constant 0 : index
    %21 = vector.load %arg8[%c0_17, %c0_18] : memref<8x128xf32, #tpu.memory_space<vmem>>, vector<8x128xf32>
    tpu.vector_store %arg8[%c0_17, %c0_18], %20 {strides = array<i32>} : memref<8x128xf32, #tpu.memory_space<vmem>>, vector<8x128xf32>,
    return
  }
  func.func @transform_0(%arg0: i32) -> (i32, i32) {
    %c0_i32 = arith.constant 0 : i32
    %c0_i32_0 = arith.constant 0 : i32
    return %arg0, %c0_i32 : i32, i32
  }
  func.func @transform_1(%arg0: i32) -> (i32, i32) {
    %c0_i32 = arith.constant 0 : i32
    %c0_i32_0 = arith.constant 0 : i32
    %c0_i32_1 = arith.constant 0 : i32
    return %c0_i32, %c0_i32_0 : i32, i32
  }
  func.func @transform_2(%arg0: i32) -> (i32, i32) {
    %c0_i32 = arith.constant 0 : i32
    %c0_i32_0 = arith.constant 0 : i32
    %c0_i32_1 = arith.constant 0 : i32
    return %c0_i32, %c0_i32_0 : i32, i32
  }
  func.func @transform_3(%arg0: i32) -> (i32, i32) {
    %c0_i32 = arith.constant 0 : i32
    %c0_i32_0 = arith.constant 0 : i32
    %c0_i32_1 = arith.constant 0 : i32
    return %c0_i32, %c0_i32_0 : i32, i32
  }
  func.func @transform_4(%arg0: i32) -> (i32, i32) {
    %c0_i32 = arith.constant 0 : i32
    %c0_i32_0 = arith.constant 0 : i32
    %c0_i32_1 = arith.constant 0 : i32
    return %c0_i32, %c0_i32_0 : i32, i32
  }
  func.func @transform_5(%arg0: i32) -> (i32, i32) {
    %c0_i32 = arith.constant 0 : i32
    %c0_i32_0 = arith.constant 0 : i32
    %c0_i32_1 = arith.constant 0 : i32
    return %c0_i32, %c0_i32_0 : i32, i32
  }
  func.func @transform_6(%arg0: i32) -> (i32, i32) {
    %c0_i32 = arith.constant 0 : i32
    %c0_i32_0 = arith.constant 0 : i32
    %c0_i32_1 = arith.constant 0 : i32
    return %c0_i32, %c0_i32_0 : i32, i32
  }
  func.func @transform_7(%arg0: i32) -> (i32, i32) {
    %c0_i32 = arith.constant 0 : i32
    %c0_i32_0 = arith.constant 0 : i32
    return %arg0, %c0_i32 : i32, i32
  }
}

</mosaic_0001>

<bundles_post_ra>
// kernel: actor_forward.1
= control target key start
LH: loop header
LB: loop body
LE: loop exit
PB: predicated region body
PF: predicated region fallthrough
CT: control target
= control target key end

     0   :  { %v423_v3 = vmov 0.0   ;;  %vm43_vm0 = vcmask 130048   ;;  %v33_v49 = vlaneseq  ;;  %vm424_vm1 = vmmov 0   ;;  %s654_s1 = inlined_call_operand.vmem [shape: f32[16,256], index: 1, kind: input, shape index: {}]   ;;  %s655_s0 = inlined_call_operand.vmem [shape: f32[8,16], index: 0, kind: input, shape index: {}]   ;;  %s656_s3 = inlined_call_operand.vmem [shape: f32[256,128], index: 3, kind: input, shape index: {}]   ;;  %s657_s5 = inlined_call_operand.vmem [shape: f32[128,128], index: 5, kind: input, shape index: {}]   ;;  %s658_s2 = inlined_call_operand.vmem [shape: f32[1,256], index: 2, kind: input, shape index: {}]   ;;  %s659_s4 = inlined_call_operand.vmem [shape: f32[1,128], index: 4, kind: input, shape index: {}]   ;;  %s660_s6 = inlined_call_operand.vmem [shape: f32[1,128], index: 6, kind: input, shape index: {}]   ;;  %s661_s7 = inlined_call_operand.vmem [shape: f32[8,128], index: 7, kind: output, shape index: {}]  }
   0x1   :  { %v30_v0 = vld [vmem:[%s654_s1 + $0x18] sm:$0xff]  ;;  %v29_v1 = vld [vmem:[%s654_s1 + $0x10] sm:$0xff]  ;;  %v28_v2 = vld [vmem:[%s654_s1 + $0x8] sm:$0xff]  ;;  %111 = vmatprep.mubr.f32.mxu0 %v423_v3 }
   0x2   :  { %75 = vmatprep.subr.mxu0 %v30_v0  ;;  %v27_v4 = vld [vmem:[%s654_s1] sm:$0xff]  ;;  %v151_v6 = vld [vmem:[%s656_s3 + $0xf8] sm:$0xff]  ;;  %v150_v8 = vld [vmem:[%s656_s3 + $0xf0] sm:$0xff]  ;;  %v34_v50 = vshrl.u32 %v33_v49, 7 }
   0x3   :  { %v26_v5 = vld [vmem:[%s655_s0] sm:$0xff]  ;;  %76 = vmatpush1.msra.mxu0 %v29_v1  ;;  %332 = vmatprep.subr.mxu1 %v151_v6  ;;  %v135_v7 = vld [vmem:[%s656_s3 + $0x78] sm:$0xff]  ;;  %v134_v9 = vld [vmem:[%s656_s3 + $0x70] sm:$0xff] }
   0x4   :  { %77 = vmatprep.subr.mxu0 %v28_v2  ;;  %333 = vmatpush3.msra.mxu1 %v135_v7  ;;  %v149_v10 = vld [vmem:[%s656_s3 + $0xe8] sm:$0xff]  ;;  %v148_v12 = vld [vmem:[%s656_s3 + $0xe0] sm:$0xff]  ;;  %v147_v14 = vld [vmem:[%s656_s3 + $0xd8] sm:$0xff]  ;;  %v35_v51 = vsub.s32 0, %v34_v50  ;;  %v39_v53 = vsub.s32 1, %v34_v50 }
   0x5   :  { %78 = vmatpush1.msra.mxu0 %v27_v4  ;;  %334 = vmatprep.subr.mxu1 %v150_v8  ;;  %v133_v11 = vld [vmem:[%s656_s3 + $0x68] sm:$0xff]  ;;  %v132_v13 = vld [vmem:[%s656_s3 + $0x60] sm:$0xff]  ;;  %v131_v15 = vld [vmem:[%s656_s3 + $0x58] sm:$0xff] }
   0x6   :  { %329 = vmatmul.mubr.msk.f32.vlgmr.msra.gmra.mxu0 %vm43_vm0, %v26_v5  ;;  %335 = vmatpush3.msra.mxu1 %v134_v9  ;;  %v146_v16 = vld [vmem:[%s656_s3 + $0xd0] sm:$0xff]  ;;  %v145_v18 = vld [vmem:[%s656_s3 + $0xc8] sm:$0xff]  ;;  %v144_v20 = vld [vmem:[%s656_s3 + $0xc0] sm:$0xff] }
   0x7   :  { %336 = vmatprep.subr.mxu1 %v149_v10  ;;  %384 = vmatprep.subr.mxu0 %v423_v3  ;;  %v130_v17 = vld [vmem:[%s656_s3 + $0x50] sm:$0xff]  ;;  %v129_v19 = vld [vmem:[%s656_s3 + $0x48] sm:$0xff]  ;;  %v128_v21 = vld [vmem:[%s656_s3 + $0x40] sm:$0xff] }
   0x8   :  { %337 = vmatpush3.msra.mxu1 %v133_v11  ;;  %v143_v22 = vld [vmem:[%s656_s3 + $0xb8] sm:$0xff]  ;;  %v142_v24 = vld [vmem:[%s656_s3 + $0xb0] sm:$0xff]  ;;  %v141_v26 = vld [vmem:[%s656_s3 + $0xa8] sm:$0xff]  ;;  %416 = vmatprep.mubr.msk.f32.mxu0 %vm424_vm1, %v423_v3 }
   0x9   :  { %338 = vmatprep.subr.mxu1 %v148_v12  ;;  %v127_v23 = vld [vmem:[%s656_s3 + $0x38] sm:$0xff]  ;;  %v126_v25 = vld [vmem:[%s656_s3 + $0x30] sm:$0xff]  ;;  %v125_v27 = vld [vmem:[%s656_s3 + $0x28] sm:$0xff] }
   0xa   :  { %339 = vmatpush3.msra.mxu1 %v132_v13  ;;  %v140_v28 = vld [vmem:[%s656_s3 + $0xa0] sm:$0xff]  ;;  %v139_v30 = vld [vmem:[%s656_s3 + $0x98] sm:$0xff]  ;;  %v138_v32 = vld [vmem:[%s656_s3 + $0x90] sm:$0xff] }
   0xb   :  { %340 = vmatprep.subr.mxu1 %v147_v14  ;;  %v124_v29 = vld [vmem:[%s656_s3 + $0x20] sm:$0xff]  ;;  %v123_v31 = vld [vmem:[%s656_s3 + $0x18] sm:$0xff]  ;;  %v122_v33 = vld [vmem:[%s656_s3 + $0x10] sm:$0xff] }
   0xc   :  { %341 = vmatpush3.msra.mxu1 %v131_v15  ;;  %v137_v34 = vld [vmem:[%s656_s3 + $0x88] sm:$0xff]  ;;  %v136_v36 = vld [vmem:[%s656_s3 + $0x80] sm:$0xff]  ;;  %v245_v38 = vld [vmem:[%s657_s5 + $0x78] sm:$0xff] }
   0xd   :  { %342 = vmatprep.subr.mxu1 %v146_v16  ;;  %v121_v35 = vld [vmem:[%s656_s3 + $0x8] sm:$0xff]  ;;  %v120_v37 = vld [vmem:[%s656_s3] sm:$0xff]  ;;  %v244_v39 = vld [vmem:[%s657_s5 + $0x70] sm:$0xff]  ;;  %385 = vmatpush3.msra.mxu0 %v245_v38 }
   0xe   :  { %343 = vmatpush3.msra.mxu1 %v130_v17  ;;  %386 = vmatprep.subr.mxu0 %v423_v3  ;;  %v243_v40 = vld [vmem:[%s657_s5 + $0x68] sm:$0xff]  ;;  %v242_v41 = vld [vmem:[%s657_s5 + $0x60] sm:$0xff]  ;;  %v241_v42 = vld [vmem:[%s657_s5 + $0x58] sm:$0xff] }
   0xf   :  { %344 = vmatprep.subr.mxu1 %v145_v18  ;;  %387 = vmatpush3.msra.mxu0 %v244_v39  ;;  %v240_v43 = vld [vmem:[%s657_s5 + $0x50] sm:$0xff]  ;;  %v239_v44 = vld [vmem:[%s657_s5 + $0x48] sm:$0xff]  ;;  %v238_v45 = vld [vmem:[%s657_s5 + $0x40] sm:$0xff] }
  0x10   :  { %345 = vmatpush3.msra.mxu1 %v129_v19  ;;  %388 = vmatprep.subr.mxu0 %v423_v3  ;;  %v237_v46 = vld [vmem:[%s657_s5 + $0x38] sm:$0xff]  ;;  %v236_v47 = vld [vmem:[%s657_s5 + $0x30] sm:$0xff]  ;;  %v235_v48 = vld [vmem:[%s657_s5 + $0x28] sm:$0xff] }
  0x11   :  { %346 = vmatprep.subr.mxu1 %v144_v20  ;;  %389 = vmatpush3.msra.mxu0 %v243_v40  ;;  %v31_v52 = vld [vmem:[%s658_s2] sm:$0x3]  ;;  %v233_v63 = vld [vmem:[%s657_s5 + $0x18] sm:$0xff]  ;;  %v232_v0 = vld [vmem:[%s657_s5 + $0x10] sm:$0xff] }
  0x12   :  { %347 = vmatpush3.msra.mxu1 %v128_v21  ;;  %390 = vmatprep.subr.mxu0 %v423_v3  ;;  %v36_v54 = vrot.slane %v31_v52, %v35_v51  ;;  %v40_v55 = vrot.slane %v31_v52, %v39_v53  ;;  %v234_v62 = vld [vmem:[%s657_s5 + $0x20] sm:$0xff]  ;;  %v231_v1 = vld [vmem:[%s657_s5 + $0x8] sm:$0xff] }
  0x13   :  { %348 = vmatprep.subr.mxu1 %v143_v22  ;;  %391 = vmatpush3.msra.mxu0 %v242_v41  ;;  %v230_v2 = vld [vmem:[%s657_s5] sm:$0xff] }
  0x14   :  { %349 = vmatpush3.msra.mxu1 %v127_v23  ;;  %392 = vmatprep.subr.mxu0 %v423_v3  ;;  %v330_v5 = vld [vmem:[%s659_s4] ss:$0 sm:$0xff] }
  0x15   :  { %350 = vmatprep.subr.mxu1 %v142_v24  ;;  %393 = vmatpush3.msra.mxu0 %v241_v42  ;;  %v331_v10 = vld [vmem:[%s660_s6] ss:$0 sm:$0xff] }
  0x16   :  { %351 = vmatpush3.msra.mxu1 %v126_v25  ;;  %394 = vmatprep.subr.mxu0 %v423_v3 }
  0x17   :  { %352 = vmatprep.subr.mxu1 %v141_v26  ;;  %395 = vmatpush3.msra.mxu0 %v240_v43 }
  0x18   :  { %353 = vmatpush3.msra.mxu1 %v125_v27  ;;  %396 = vmatprep.subr.mxu0 %v423_v3 }
  0x19   :  { %354 = vmatprep.subr.mxu1 %v140_v28  ;;  %397 = vmatpush3.msra.mxu0 %v239_v44 }
  0x1a   :  { %355 = vmatpush3.msra.mxu1 %v124_v29  ;;  %398 = vmatprep.subr.mxu0 %v423_v3 }
  0x1b   :  { %356 = vmatprep.subr.mxu1 %v139_v30  ;;  %399 = vmatpush3.msra.mxu0 %v238_v45 }
  0x1c   :  { %357 = vmatpush3.msra.mxu1 %v123_v31  ;;  %400 = vmatprep.subr.mxu0 %v423_v3 }
  0x1d   :  { %358 = vmatprep.subr.mxu1 %v138_v32  ;;  %401 = vmatpush3.msra.mxu0 %v237_v46 }
  0x1e   :  { %359 = vmatpush3.msra.mxu1 %v122_v33  ;;  %402 = vmatprep.subr.mxu0 %v423_v3 }
  0x1f   :  { %360 = vmatprep.subr.mxu1 %v137_v34  ;;  %403 = vmatpush3.msra.mxu0 %v236_v47 }
  0x20   :  { %361 = vmatpush3.msra.mxu1 %v121_v35  ;;  %404 = vmatprep.subr.mxu0 %v423_v3 }
  0x21   :  { %362 = vmatprep.subr.mxu1 %v136_v36  ;;  %405 = vmatpush3.msra.mxu0 %v235_v48 }
  0x22   :  { %363 = vmatpush3.msra.mxu1 %v120_v37  ;;  %406 = vmatprep.subr.mxu0 %v423_v3 }
  0x23   :  { %407 = vmatpush3.msra.mxu0 %v234_v62 }
  0x24   :  { %408 = vmatprep.subr.mxu0 %v423_v3 }
  0x25   :  { %409 = vmatpush3.msra.mxu0 %v233_v63 }
  0x26   :  { %410 = vmatprep.subr.mxu0 %v423_v3 }
  0x27   :  { %411 = vmatpush3.msra.mxu0 %v232_v0 }
  0x28   :  { %412 = vmatprep.subr.mxu0 %v423_v3 }
  0x29   :  { %413 = vmatpush3.msra.mxu0 %v231_v1 }
  0x2a   :  { %414 = vmatprep.subr.mxu0 %v423_v3 }
  0x2b   :  { %415 = vmatpush3.msra.mxu0 %v230_v2 }
  0xc6   :  { %v113_v56 = vpop.f32.mrf.mxu0 }
  0xc7   :  { %v114_v57 = vadd.f32 %v113_v56, %v36_v54 }
  0xc8   :  { %v115_v58 = vpop.f32.mrf.mxu0 }
  0xc9   :  { %v116_v59 = vadd.f32 %v115_v58, %v40_v55  ;;  %v118_v61 = vmax.f32 %v114_v57, 0.0 }
  0xcb   :  { %v119_v60 = vmax.f32 %v116_v59, 0.0 }
  0xcd   :  { %223 = vmatprep.mubr.f32.mxu1 %v119_v60 }
  0xce   :  { %224 = vmatmul.mubr.f32.vlgmr.msra.gmra.mxu1 %v118_v61 }
 0x18e   :  { %v364_v4 = vpop.f32.mrf.mxu1 }
 0x190   :  { %v365_v6 = vpop.f32.mrf.mxu1 }
 0x191   :  { %v366_v7 = vadd.f32 %v365_v6, %v364_v4 }
 0x193   :  { %v226_v8 = vadd.f32 %v366_v7, %v330_v5 }
 0x195   :  { %v229_v9 = vmax.f32 %v226_v8, 0.0 }
 0x197   :  { %417 = vmatmul.mubr.f32.vlgmr.msra.gmra.mxu0 %v229_v9 }
 0x257   :  { %v319_v11 = vpop.f32.mrf.mxu0 }
 0x258   :  { %v320_v12 = vadd.f32 %v331_v10, %v319_v11 }
 0x259   :  { %v418_v13 = vpop.f32.mrf.mxu0 }
 0x25a   :  { %421 = vtanh.f32 %v320_v12 }
 0x267   :  { %v422_v14 = vpop.eup %421 }
 0x268   :  { %324 = vst [vmem:[%s661_s7] sm:$0xff] %v422_v14 }

</bundles_post_ra>
